<compile_context>
chip_gen: v5e
topology: v5e:2x2
jax: 0.10.0
libtpu: 0.0.40
codegen_flags: <defaults>
</compile_context>

<pallas_src>
import functools
import math

import jax
import jax.numpy as jnp
from jax import lax
from jax.scipy.linalg import block_diag
from jax.experimental import pallas as pl
from jax.experimental.pallas import tpu as pltpu


# ----------------------------- fused Pallas kernel ---------------------------------

def fused_complexnet_kernel(x_ref, rb1_ref, c1_ref, ph1_ref, pw1_ref,
                            rb2_ref, c2_ref, lstk_ref, w1m_ref,
                            fw2_ref, fw3_ref, bias_ref, o_ref,
                            *, ksize, hs3, batch, n1, n2, nf1, nf2, nf3):
    f32 = jnp.float32
    x = x_ref[...]                                                   # (B*H, 2*W)

    # conv1 (both branches via block-diag weights): 1 fat matmul + K row-select matmuls.
    y1 = jnp.dot(x, c1_ref[...], preferred_element_type=f32)        # (B*H, K*n1)
    a1 = jnp.dot(rb1_ref[0], y1[:, 0:n1], preferred_element_type=f32)
    for kh in range(1, ksize):
        a1 = a1 + jnp.dot(rb1_ref[kh], y1[:, kh * n1:(kh + 1) * n1],
                          preferred_element_type=f32)
    a1 = jnp.maximum(a1 + bias_ref[0:1, 0:n1], 0.0)                  # (B*h1o, n1)

    # 2x2 avg-pool #1 (rows then lanes) as two matmuls with precomputed 0/0.5 matrices.
    p1 = jnp.dot(ph1_ref[...],
                 jnp.dot(a1, pw1_ref[...], preferred_element_type=f32),
                 preferred_element_type=f32)                         # (B*hs2, 2*cout*ws2)

    # conv2, same structure.
    y2 = jnp.dot(p1, c2_ref[...], preferred_element_type=f32)       # (B*hs2, K*n2)
    a2 = jnp.dot(rb2_ref[0], y2[:, 0:n2], preferred_element_type=f32)
    for kh in range(1, ksize):
        a2 = a2 + jnp.dot(rb2_ref[kh], y2[:, kh * n2:(kh + 1) * n2],
                          preferred_element_type=f32)
    a2 = jnp.maximum(a2 + bias_ref[1:2, 0:n2], 0.0)                  # (B*h2o, n2)

    # 2x2 avg-pool #2 + PyTorch (C,H,W) flatten + fc1, fused (rflat@fc1 pre-folded).
    av = jnp.dot(lstk_ref[...], a2, preferred_element_type=f32)      # (hs3*B, n2)
    z = jnp.dot(av[0:batch], w1m_ref[0], preferred_element_type=f32)
    for h in range(1, hs3):
        z = z + jnp.dot(av[h * batch:(h + 1) * batch], w1m_ref[h],
                        preferred_element_type=f32)
    z = jnp.maximum(z + bias_ref[2:3, 0:nf1], 0.0)                   # (B, 2*l0)

    # fc2 (block-diag) + ReLU; fc3 (row-stacked weights => directly yields r+c sum).
    z = jnp.maximum(jnp.dot(z, fw2_ref[...], preferred_element_type=f32)
                    + bias_ref[3:4, 0:nf2], 0.0)                     # (B, 2*l1)
    out = jnp.dot(z, fw3_ref[...], preferred_element_type=f32) + bias_ref[4:5, 0:nf3]
    o_ref[...] = out.astype(o_ref.dtype)                             # (B, odim)


# --------------------- structural / weight-folded matrix builders ------------------
# (all of this runs ONCE in prepare_operands, never in the jitted forward)

def _pool_rows(n):
    """(n//2, n) matrix averaging adjacent row pairs (floor-truncates odd n)."""
    r = jnp.arange(n // 2)[:, None]
    c = jnp.arange(n)[None, :]
    return jnp.where((c == 2 * r) | (c == 2 * r + 1), 0.5, 0.0).astype(jnp.float32)


def _row_select_matrices(h_in, h_out, ksize, paddle, batch):
    """(K, batch*h_out, batch*h_in): block-diag over batch of circular row-shift
    selection R_kh[i, r] = 1 iff r == (i + kh - paddle) mod h_in."""
    i = jnp.arange(h_out)[:, None]
    r = jnp.arange(h_in)[None, :]
    eye_b = jnp.eye(batch, dtype=jnp.float32)
    return jnp.stack(
        [jnp.kron(eye_b, (r == ((i + kh - paddle) % h_in)).astype(jnp.float32))
         for kh in range(ksize)], axis=0)


def _conv_col_matrices(w, w_in, w_out, paddle):
    """Fold circular padding, kw taps and channel contraction into K matrices.
    w: (Cout, Cin, K, K) OIHW.  Returns list of K (Cin*w_in, Cout*w_out)."""
    cout, cin, k, _ = w.shape
    m = jnp.arange(w_in)[:, None]
    j = jnp.arange(w_out)[None, :]
    mats = []
    for kh in range(k):
        blk = jnp.zeros((cin, w_in, cout, w_out), jnp.float32)
        for kw in range(k):
            hit = (m == ((j + kw - paddle) % w_in)).astype(jnp.float32)  # (w_in, w_out)
            blk = blk + hit[None, :, None, :] * w[:, :, kh, kw].T[:, None, :, None]
        mats.append(blk.reshape(cin * w_in, cout * w_out))
    return mats


def _pool_flatten_left_stack(h2o, hs3, batch):
    """(hs3*batch, batch*h2o): rows grouped by pooled-row index h; row (h*B+b) averages
    a2 rows {b*h2o+2h, b*h2o+2h+1}."""
    b = jnp.arange(batch)[:, None]
    r = jnp.arange(batch * h2o)[None, :]
    rows = []
    for h in range(hs3):
        sel = ((r == b * h2o + 2 * h) | (r == b * h2o + 2 * h + 1)).astype(jnp.float32)
        rows.append(0.5 * sel)
    return jnp.concatenate(rows, axis=0)


def _pool_flatten_right(w2o, hs3, ws3, cout):
    """List of hs3 (cout*w2o, cout*hs3*ws3): column pooling + scatter into PyTorch
    flatten positions o*hs3*ws3 + h*ws3 + w."""
    m = jnp.arange(w2o)[:, None]
    wj = jnp.arange(ws3)[None, :]
    base = 0.5 * ((m == 2 * wj) | (m == 2 * wj + 1)).astype(jnp.float32)  # (w2o, ws3)
    eye_c = jnp.eye(cout, dtype=jnp.float32)
    mats = []
    for h in range(hs3):
        blk = jnp.zeros((w2o, hs3 * ws3), jnp.float32)
        blk = blk.at[:, h * ws3:(h + 1) * ws3].set(base)
        mats.append(jnp.kron(eye_c, blk))
    return mats


def prepare_operands(params, *, batch, H, W, paddle):
    """Build all constant kernel operands once (hoisted out of the hot path)."""
    f32 = jnp.float32
    cout, cin1, K, _ = params["r"]["conv1_w"].shape
    assert cin1 == 1

    # spatial bookkeeping (matches the PyTorch module's __init__ arithmetic)
    h1o, w1o = H + 2 * paddle - K + 1, W + 2 * paddle - K + 1
    hs2, ws2 = h1o // 2, w1o // 2
    h2o, w2o = hs2 + 2 * paddle - K + 1, ws2 + 2 * paddle - K + 1
    hs3, ws3 = h2o // 2, w2o // 2
    l0 = params["r"]["fc1_w"].shape[1]
    l1 = params["r"]["fc2_w"].shape[1]
    odim = params["r"]["fc3_w"].shape[1]

    # --- shape-only structural matrices
    rb1 = _row_select_matrices(H, h1o, K, paddle, batch)             # (K, B*h1o, B*H)
    rb2 = _row_select_matrices(hs2, h2o, K, paddle, batch)           # (K, B*h2o, B*hs2)
    ph1 = jnp.kron(jnp.eye(batch, dtype=f32), _pool_rows(h1o))       # (B*hs2, B*h1o)
    pw1 = jnp.kron(jnp.eye(2 * cout, dtype=f32), _pool_rows(w1o).T)  # (2cout*w1o, 2cout*ws2)
    lstk = _pool_flatten_left_stack(h2o, hs3, batch)                 # (hs3*B, B*h2o)
    rflat = _pool_flatten_right(w2o, hs3, ws3, cout)                 # hs3 x (cout*w2o, flat)

    # --- weight-folded matrices (both branches merged block-diagonally)
    pr, pc = params["r"], params["c"]
    c1_r = _conv_col_matrices(pr["conv1_w"].astype(f32), W, w1o, paddle)
    c1_c = _conv_col_matrices(pc["conv1_w"].astype(f32), W, w1o, paddle)
    c1_cat = jnp.concatenate([block_diag(a, b) for a, b in zip(c1_r, c1_c)], axis=1)
    # (2*W, K * 2*cout*w1o)
    c2_r = _conv_col_matrices(pr["conv2_w"].astype(f32), ws2, w2o, paddle)
    c2_c = _conv_col_matrices(pc["conv2_w"].astype(f32), ws2, w2o, paddle)
    c2_cat = jnp.concatenate([block_diag(a, b) for a, b in zip(c2_r, c2_c)], axis=1)
    # (2*cout*ws2, K * 2*cout*w2o)

    fw1_r, fw1_c = pr["fc1_w"].astype(f32), pc["fc1_w"].astype(f32)
    w1m = jnp.stack([block_diag(r @ fw1_r, r @ fw1_c) for r in rflat], axis=0)
    # (hs3, 2*cout*w2o, 2*l0)
    fw2m = block_diag(pr["fc2_w"].astype(f32), pc["fc2_w"].astype(f32))   # (2*l0, 2*l1)
    fw3s = jnp.concatenate([pr["fc3_w"].astype(f32), pc["fc3_w"].astype(f32)], axis=0)
    # (2*l1, odim) -- row-stacked so z @ fw3s == z_r @ fw3_r + z_c @ fw3_c (the final add)

    n1, n2 = 2 * cout * w1o, 2 * cout * w2o
    nf1, nf2, nf3 = 2 * l0, 2 * l1, odim
    bias_w = max(128, ((max(n1, n2, nf1, nf2, nf3) + 127) // 128) * 128)

    def _pad(v):
        return jnp.pad(v, (0, bias_w - v.shape[0]))

    bias_pack = jnp.stack([
        _pad(jnp.concatenate([jnp.repeat(pr["conv1_b"].astype(f32), w1o),
                              jnp.repeat(pc["conv1_b"].astype(f32), w1o)])),
        _pad(jnp.concatenate([jnp.repeat(pr["conv2_b"].astype(f32), w2o),
                              jnp.repeat(pc["conv2_b"].astype(f32), w2o)])),
        _pad(jnp.concatenate([pr["fc1_b"].astype(f32), pc["fc1_b"].astype(f32)])),
        _pad(jnp.concatenate([pr["fc2_b"].astype(f32), pc["fc2_b"].astype(f32)])),
        _pad(pr["fc3_b"].astype(f32) + pc["fc3_b"].astype(f32)),
    ], axis=0)                                                       # (5, bias_w)

    operands = (rb1, c1_cat, ph1, pw1, rb2, c2_cat, lstk, w1m, fw2m, fw3s, bias_pack)
    meta = dict(ksize=K, hs3=hs3, batch=batch, n1=n1, n2=n2,
                nf1=nf1, nf2=nf2, nf3=nf3, odim=odim, H=H, W=W)
    return operands, meta


# ----------------------------- fused forward (hot path) ----------------------------

def complexnet_forward(operands, x_and_y, meta):
    B, nbranch, H, W = x_and_y.shape
    assert nbranch == 2 and B == meta["batch"] and H == meta["H"] and W == meta["W"]
    odim = meta["odim"]

    # lane-merged, batch-row-stacked input: (B*H, 2*W); branch r -> lanes [0,W),
    # branch c -> lanes [W, 2W).  This is the only wrapper-side op in the hot path.
    x_cat = jnp.transpose(x_and_y, (0, 2, 1, 3)).reshape(B * H, 2 * W).astype(jnp.float32)

    kern = functools.partial(
        fused_complexnet_kernel, ksize=meta["ksize"], hs3=meta["hs3"], batch=B,
        n1=meta["n1"], n2=meta["n2"], nf1=meta["nf1"], nf2=meta["nf2"], nf3=meta["nf3"])

    all_in = (x_cat,) + tuple(operands)

    def _full_spec(arr):
        nd = arr.ndim
        return pl.BlockSpec(tuple(arr.shape), lambda i, _nd=nd: (0,) * _nd)

    out = pl.pallas_call(
        kern,
        out_shape=jax.ShapeDtypeStruct((B, odim), jnp.float32),
        grid=(1,),
        in_specs=[_full_spec(a) for a in all_in],
        out_specs=pl.BlockSpec((B, odim), lambda i: (0, 0)),
        compiler_params=pltpu.CompilerParams(dimension_semantics=("arbitrary",)),
    )(*all_in)
    return out


# ----------------------------- pure-JAX reference ----------------------------------

def _circ_pad(x, p):
    return jnp.pad(x, ((0, 0), (0, 0), (p, p), (p, p)), mode="wrap")


def _ref_conv_relu_pool(x, w, b, paddle):
    xp = _circ_pad(x, paddle)
    out = lax.conv_general_dilated(xp, w, window_strides=(1, 1), padding="VALID",
                                   dimension_numbers=("NCHW", "OIHW", "NCHW"))
    out = jnp.maximum(out + b[None, :, None, None], 0.0)
    B, C, H, W = out.shape
    return out.reshape(B, C, H // 2, 2, W // 2, 2).mean(axis=(3, 5))


def _ref_branch(img, p, paddle):
    h = _ref_conv_relu_pool(img, p["conv1_w"], p["conv1_b"], paddle)
    h = _ref_conv_relu_pool(h, p["conv2_w"], p["conv2_b"], paddle)
    flat = h.reshape(h.shape[0], -1)
    h = jnp.maximum(flat @ p["fc1_w"] + p["fc1_b"], 0.0)
    h = jnp.maximum(h @ p["fc2_w"] + p["fc2_b"], 0.0)
    return h @ p["fc3_w"] + p["fc3_b"]


def ref_forward(params, x_and_y, paddle):
    return (_ref_branch(x_and_y[:, 0:1], params["r"], paddle)
            + _ref_branch(x_and_y[:, 1:2], params["c"], paddle))


# ----------------------------- init + main -----------------------------------------

def init_branch_params(key, out_channels, ksize, flat_dim, l0, l1, odim):
    ks = jax.random.split(key, 10)
    f32 = jnp.float32
    return {
        "conv1_w": 0.3 * jax.random.normal(ks[0], (out_channels, 1, ksize, ksize), f32),
        "conv1_b": 0.1 * jax.random.normal(ks[1], (out_channels,), f32),
        "conv2_w": 0.2 * jax.random.normal(ks[2], (out_channels, out_channels, ksize, ksize), f32),
        "conv2_b": 0.1 * jax.random.normal(ks[3], (out_channels,), f32),
        "fc1_w": jax.random.normal(ks[4], (flat_dim, l0), f32) / math.sqrt(flat_dim),
        "fc1_b": 0.1 * jax.random.normal(ks[5], (l0,), f32),
        "fc2_w": jax.random.normal(ks[6], (l0, l1), f32) / math.sqrt(l0),
        "fc2_b": 0.1 * jax.random.normal(ks[7], (l1,), f32),
        "fc3_w": jax.random.normal(ks[8], (l1, odim), f32) / math.sqrt(l1),
        "fc3_b": 0.1 * jax.random.normal(ks[9], (odim,), f32),
    }


if __name__ == "__main__":
    # small config consistent with the module's __init__ arithmetic
    nc = 3                 # -> output dim 2*nc+1 = 7
    n_tgt, n_dir = 16, 16  # H, W
    out_channels = 4
    kernel_size = 3
    paddle = 1
    linear_dim = (32, 16)
    batch = 2

    outdim1 = n_tgt + 2 * paddle - kernel_size + 1
    outdim2 = n_dir + 2 * paddle - kernel_size + 1
    outdim1, outdim2 = int(outdim1 / 2), int(outdim2 / 2)
    outdim1 = int((outdim1 + 2 * paddle - kernel_size + 1) / 2)
    outdim2 = int((outdim2 + 2 * paddle - kernel_size + 1) / 2)
    flat_dim = out_channels * outdim1 * outdim2
    odim = 2 * nc + 1

    root = jax.random.PRNGKey(0)
    k_in, k_r, k_c = jax.random.split(root, 3)
    x_and_y = jax.random.normal(k_in, (batch, 2, n_tgt, n_dir), jnp.float32)
    params = {
        "r": init_branch_params(k_r, out_channels, kernel_size, flat_dim,
                                linear_dim[0], linear_dim[1], odim),
        "c": init_branch_params(k_c, out_channels, kernel_size, flat_dim,
                                linear_dim[0], linear_dim[1], odim),
    }

    # One-time setup: build structural + weight-folded operands (NOT in the hot path).
    operands, meta = prepare_operands(params, batch=batch, H=n_tgt, W=n_dir, paddle=paddle)
    operands = jax.tree_util.tree_map(jax.block_until_ready, operands)

    fwd = jax.jit(functools.partial(complexnet_forward, meta=meta))
    out = jax.block_until_ready(fwd(operands, x_and_y))

    ref = jax.block_until_ready(ref_forward(params, x_and_y, paddle))
    assert out.shape == (batch, odim), out.shape
    assert jnp.allclose(out, ref, atol=2e-3, rtol=2e-3), (out, ref)
    print("KERNEL_OK")
</pallas_src>

<mosaic_0001>
module attributes {stable_mosaic.version = 11 : i64} {
  func.func @fused_complexnet_kernel(%arg0: i32, %arg1: memref<32x32xf32, #tpu.memory_space<vmem>>, %arg2: memref<3x32x32xf32, #tpu.memory_space<vmem>>, %arg3: memref<32x384xf32, #tpu.memory_space<vmem>>, %arg4: memref<16x32xf32, #tpu.memory_space<vmem>>, %arg5: memref<128x64xf32, #tpu.memory_space<vmem>>, %arg6: memref<3x16x16xf32, #tpu.memory_space<vmem>>, %arg7: memref<64x192xf32, #tpu.memory_space<vmem>>, %arg8: memref<8x16xf32, #tpu.memory_space<vmem>>, %arg9: memref<4x64x64xf32, #tpu.memory_space<vmem>>, %arg10: memref<64x32xf32, #tpu.memory_space<vmem>>, %arg11: memref<32x7xf32, #tpu.memory_space<vmem>>, %arg12: memref<5x128xf32, #tpu.memory_space<vmem>>, %arg13: memref<2x7xf32, #tpu.memory_space<vmem>>) attributes {dimension_semantics = [#tpu.dimension_semantics<arbitrary>], iteration_bounds = array<i64: 1>, scalar_prefetch = 0 : i64, scratch_operands = 0 : i64, tpu.core_type = #tpu.core_type<tc>, window_params = [{pipeline_mode = #tpu.pipeline_mode<synchronous>, transform_indices = @transform_0, window_bounds = array<i64: 32, 32>}, {pipeline_mode = #tpu.pipeline_mode<synchronous>, transform_indices = @transform_1, window_bounds = array<i64: 3, 32, 32>}, {pipeline_mode = #tpu.pipeline_mode<synchronous>, transform_indices = @transform_2, window_bounds = array<i64: 32, 384>}, {pipeline_mode = #tpu.pipeline_mode<synchronous>, transform_indices = @transform_3, window_bounds = array<i64: 16, 32>}, {pipeline_mode = #tpu.pipeline_mode<synchronous>, transform_indices = @transform_4, window_bounds = array<i64: 128, 64>}, {pipeline_mode = #tpu.pipeline_mode<synchronous>, transform_indices = @transform_5, window_bounds = array<i64: 3, 16, 16>}, {pipeline_mode = #tpu.pipeline_mode<synchronous>, transform_indices = @transform_6, window_bounds = array<i64: 64, 192>}, {pipeline_mode = #tpu.pipeline_mode<synchronous>, transform_indices = @transform_7, window_bounds = array<i64: 8, 16>}, {pipeline_mode = #tpu.pipeline_mode<synchronous>, transform_indices = @transform_8, window_bounds = array<i64: 4, 64, 64>}, {pipeline_mode = #tpu.pipeline_mode<synchronous>, transform_indices = @transform_9, window_bounds = array<i64: 64, 32>}, {pipeline_mode = #tpu.pipeline_mode<synchronous>, transform_indices = @transform_10, window_bounds = array<i64: 32, 7>}, {pipeline_mode = #tpu.pipeline_mode<synchronous>, transform_indices = @transform_11, window_bounds = array<i64: 5, 128>}, {pipeline_mode = #tpu.pipeline_mode<synchronous>, transform_indices = @transform_12, window_bounds = array<i64: 2, 7>}]} {
    %c0 = arith.constant 0 : index
    %c0_0 = arith.constant 0 : index
    %0 = vector.load %arg1[%c0, %c0_0] : memref<32x32xf32, #tpu.memory_space<vmem>>, vector<32x32xf32>
    %c0_1 = arith.constant 0 : index
    %c0_2 = arith.constant 0 : index
    %1 = vector.load %arg3[%c0_1, %c0_2] : memref<32x384xf32, #tpu.memory_space<vmem>>, vector<32x384xf32>
    %cst = arith.constant dense<0.000000e+00> : vector<32x384xf32>
    %2 = tpu.matmul %0, %1, %cst {dimension_numbers = #tpu.dot_dimension_numbers<[1], [0], [0], [1], [0, 0, 1, 1], [], []>} : vector<32x32xf32>, vector<32x384xf32>, vector<32x384xf32> -> vector<32x384xf32>
    %c0_3 = arith.constant 0 : index
    %c0_4 = arith.constant 0 : index
    %c0_5 = arith.constant 0 : index
    %3 = vector.load %arg2[%c0_3, %c0_4, %c0_5] : memref<3x32x32xf32, #tpu.memory_space<vmem>>, vector<1x32x32xf32>
    %4 = vector.shape_cast %3 : vector<1x32x32xf32> to vector<32x32xf32>
    %5 = vector.extract_strided_slice %2 {offsets = [0, 0], sizes = [32, 128], strides = [1, 1]} : vector<32x384xf32> to vector<32x128xf32>
    %cst_6 = arith.constant dense<0.000000e+00> : vector<32x128xf32>
    %6 = tpu.matmul %4, %5, %cst_6 {dimension_numbers = #tpu.dot_dimension_numbers<[1], [0], [0], [1], [0, 0, 1, 1], [], []>} : vector<32x32xf32>, vector<32x128xf32>, vector<32x128xf32> -> vector<32x128xf32>
    %c1 = arith.constant 1 : index
    %c0_7 = arith.constant 0 : index
    %c0_8 = arith.constant 0 : index
    %7 = vector.load %arg2[%c1, %c0_7, %c0_8] : memref<3x32x32xf32, #tpu.memory_space<vmem>>, vector<1x32x32xf32>
    %8 = vector.shape_cast %7 : vector<1x32x32xf32> to vector<32x32xf32>
    %9 = vector.extract_strided_slice %2 {offsets = [0, 128], sizes = [32, 128], strides = [1, 1]} : vector<32x384xf32> to vector<32x128xf32>
    %cst_9 = arith.constant dense<0.000000e+00> : vector<32x128xf32>
    %10 = tpu.matmul %8, %9, %cst_9 {dimension_numbers = #tpu.dot_dimension_numbers<[1], [0], [0], [1], [0, 0, 1, 1], [], []>} : vector<32x32xf32>, vector<32x128xf32>, vector<32x128xf32> -> vector<32x128xf32>
    %11 = arith.addf %6, %10 : vector<32x128xf32>
    %c2 = arith.constant 2 : index
    %c0_10 = arith.constant 0 : index
    %c0_11 = arith.constant 0 : index
    %12 = vector.load %arg2[%c2, %c0_10, %c0_11] : memref<3x32x32xf32, #tpu.memory_space<vmem>>, vector<1x32x32xf32>
    %13 = vector.shape_cast %12 : vector<1x32x32xf32> to vector<32x32xf32>
    %14 = vector.extract_strided_slice %2 {offsets = [0, 256], sizes = [32, 128], strides = [1, 1]} : vector<32x384xf32> to vector<32x128xf32>
    %cst_12 = arith.constant dense<0.000000e+00> : vector<32x128xf32>
    %15 = tpu.matmul %13, %14, %cst_12 {dimension_numbers = #tpu.dot_dimension_numbers<[1], [0], [0], [1], [0, 0, 1, 1], [], []>} : vector<32x32xf32>, vector<32x128xf32>, vector<32x128xf32> -> vector<32x128xf32>
    %16 = arith.addf %11, %15 : vector<32x128xf32>
    %c0_13 = arith.constant 0 : index
    %c0_14 = arith.constant 0 : index
    %17 = vector.load %arg12[%c0_13, %c0_14] : memref<5x128xf32, #tpu.memory_space<vmem>>, vector<1x128xf32>
    %18 = vector.broadcast %17 : vector<1x128xf32> to vector<32x128xf32>
    %19 = arith.addf %16, %18 : vector<32x128xf32>
    %cst_15 = arith.constant 0.000000e+00 : f32
    %20 = vector.broadcast %cst_15 : f32 to vector<32x128xf32>
    %21 = arith.maximumf %19, %20 : vector<32x128xf32>
    %c0_16 = arith.constant 0 : index
    %c0_17 = arith.constant 0 : index
    %22 = vector.load %arg4[%c0_16, %c0_17] : memref<16x32xf32, #tpu.memory_space<vmem>>, vector<16x32xf32>
    %c0_18 = arith.constant 0 : index
    %c0_19 = arith.constant 0 : index
    %23 = vector.load %arg5[%c0_18, %c0_19] : memref<128x64xf32, #tpu.memory_space<vmem>>, vector<128x64xf32>
    %cst_20 = arith.constant dense<0.000000e+00> : vector<32x64xf32>
    %24 = tpu.matmul %21, %23, %cst_20 {dimension_numbers = #tpu.dot_dimension_numbers<[1], [0], [0], [1], [0, 0, 1, 1], [], []>} : vector<32x128xf32>, vector<128x64xf32>, vector<32x64xf32> -> vector<32x64xf32>
    %cst_21 = arith.constant dense<0.000000e+00> : vector<16x64xf32>
    %25 = tpu.matmul %22, %24, %cst_21 {dimension_numbers = #tpu.dot_dimension_numbers<[1], [0], [0], [1], [0, 0, 1, 1], [], []>} : vector<16x32xf32>, vector<32x64xf32>, vector<16x64xf32> -> vector<16x64xf32>
    %c0_22 = arith.constant 0 : index
    %c0_23 = arith.constant 0 : index
    %26 = vector.load %arg7[%c0_22, %c0_23] : memref<64x192xf32, #tpu.memory_space<vmem>>, vector<64x192xf32>
    %cst_24 = arith.constant dense<0.000000e+00> : vector<16x192xf32>
    %27 = tpu.matmul %25, %26, %cst_24 {dimension_numbers = #tpu.dot_dimension_numbers<[1], [0], [0], [1], [0, 0, 1, 1], [], []>} : vector<16x64xf32>, vector<64x192xf32>, vector<16x192xf32> -> vector<16x192xf32>
    %c0_25 = arith.constant 0 : index
    %c0_26 = arith.constant 0 : index
    %c0_27 = arith.constant 0 : index
    %28 = vector.load %arg6[%c0_25, %c0_26, %c0_27] : memref<3x16x16xf32, #tpu.memory_space<vmem>>, vector<1x16x16xf32>
    %29 = vector.shape_cast %28 : vector<1x16x16xf32> to vector<16x16xf32>
    %30 = vector.extract_strided_slice %27 {offsets = [0, 0], sizes = [16, 64], strides = [1, 1]} : vector<16x192xf32> to vector<16x64xf32>
    %cst_28 = arith.constant dense<0.000000e+00> : vector<16x64xf32>
    %31 = tpu.matmul %29, %30, %cst_28 {dimension_numbers = #tpu.dot_dimension_numbers<[1], [0], [0], [1], [0, 0, 1, 1], [], []>} : vector<16x16xf32>, vector<16x64xf32>, vector<16x64xf32> -> vector<16x64xf32>
    %c1_29 = arith.constant 1 : index
    %c0_30 = arith.constant 0 : index
    %c0_31 = arith.constant 0 : index
    %32 = vector.load %arg6[%c1_29, %c0_30, %c0_31] : memref<3x16x16xf32, #tpu.memory_space<vmem>>, vector<1x16x16xf32>
    %33 = vector.shape_cast %32 : vector<1x16x16xf32> to vector<16x16xf32>
    %34 = vector.extract_strided_slice %27 {offsets = [0, 64], sizes = [16, 64], strides = [1, 1]} : vector<16x192xf32> to vector<16x64xf32>
    %cst_32 = arith.constant dense<0.000000e+00> : vector<16x64xf32>
    %35 = tpu.matmul %33, %34, %cst_32 {dimension_numbers = #tpu.dot_dimension_numbers<[1], [0], [0], [1], [0, 0, 1, 1], [], []>} : vector<16x16xf32>, vector<16x64xf32>, vector<16x64xf32> -> vector<16x64xf32>
    %36 = arith.addf %31, %35 : vector<16x64xf32>
    %c2_33 = arith.constant 2 : index
    %c0_34 = arith.constant 0 : index
    %c0_35 = arith.constant 0 : index
    %37 = vector.load %arg6[%c2_33, %c0_34, %c0_35] : memref<3x16x16xf32, #tpu.memory_space<vmem>>, vector<1x16x16xf32>
    %38 = vector.shape_cast %37 : vector<1x16x16xf32> to vector<16x16xf32>
    %39 = vector.extract_strided_slice %27 {offsets = [0, 128], sizes = [16, 64], strides = [1, 1]} : vector<16x192xf32> to vector<16x64xf32>
    %cst_36 = arith.constant dense<0.000000e+00> : vector<16x64xf32>
    %40 = tpu.matmul %38, %39, %cst_36 {dimension_numbers = #tpu.dot_dimension_numbers<[1], [0], [0], [1], [0, 0, 1, 1], [], []>} : vector<16x16xf32>, vector<16x64xf32>, vector<16x64xf32> -> vector<16x64xf32>
    %41 = arith.addf %36, %40 : vector<16x64xf32>
    %c1_37 = arith.constant 1 : index
    %c0_38 = arith.constant 0 : index
    %42 = vector.load %arg12[%c1_37, %c0_38] : memref<5x128xf32, #tpu.memory_space<vmem>>, vector<1x64xf32>
    %43 = vector.broadcast %42 : vector<1x64xf32> to vector<16x64xf32>
    %44 = arith.addf %41, %43 : vector<16x64xf32>
    %cst_39 = arith.constant 0.000000e+00 : f32
    %45 = vector.broadcast %cst_39 : f32 to vector<16x64xf32>
    %46 = arith.maximumf %44, %45 : vector<16x64xf32>
    %c0_40 = arith.constant 0 : index
    %c0_41 = arith.constant 0 : index
    %47 = vector.load %arg8[%c0_40, %c0_41] : memref<8x16xf32, #tpu.memory_space<vmem>>, vector<8x16xf32>
    %cst_42 = arith.constant dense<0.000000e+00> : vector<8x64xf32>
    %48 = tpu.matmul %47, %46, %cst_42 {dimension_numbers = #tpu.dot_dimension_numbers<[1], [0], [0], [1], [0, 0, 1, 1], [], []>} : vector<8x16xf32>, vector<16x64xf32>, vector<8x64xf32> -> vector<8x64xf32>
    %49 = vector.extract_strided_slice %48 {offsets = [0, 0], sizes = [2, 64], strides = [1, 1]} : vector<8x64xf32> to vector<2x64xf32>
    %c0_43 = arith.constant 0 : index
    %c0_44 = arith.constant 0 : index
    %c0_45 = arith.constant 0 : index
    %50 = vector.load %arg9[%c0_43, %c0_44, %c0_45] : memref<4x64x64xf32, #tpu.memory_space<vmem>>, vector<1x64x64xf32>
    %51 = vector.shape_cast %50 : vector<1x64x64xf32> to vector<64x64xf32>
    %cst_46 = arith.constant dense<0.000000e+00> : vector<2x64xf32>
    %52 = tpu.matmul %49, %51, %cst_46 {dimension_numbers = #tpu.dot_dimension_numbers<[1], [0], [0], [1], [0, 0, 1, 1], [], []>} : vector<2x64xf32>, vector<64x64xf32>, vector<2x64xf32> -> vector<2x64xf32>
    %53 = vector.extract_strided_slice %48 {offsets = [2, 0], sizes = [2, 64], strides = [1, 1]} : vector<8x64xf32> to vector<2x64xf32>
    %c1_47 = arith.constant 1 : index
    %c0_48 = arith.constant 0 : index
    %c0_49 = arith.constant 0 : index
    %54 = vector.load %arg9[%c1_47, %c0_48, %c0_49] : memref<4x64x64xf32, #tpu.memory_space<vmem>>, vector<1x64x64xf32>
    %55 = vector.shape_cast %54 : vector<1x64x64xf32> to vector<64x64xf32>
    %cst_50 = arith.constant dense<0.000000e+00> : vector<2x64xf32>
    %56 = tpu.matmul %53, %55, %cst_50 {dimension_numbers = #tpu.dot_dimension_numbers<[1], [0], [0], [1], [0, 0, 1, 1], [], []>} : vector<2x64xf32>, vector<64x64xf32>, vector<2x64xf32> -> vector<2x64xf32>
    %57 = arith.addf %52, %56 : vector<2x64xf32>
    %58 = vector.extract_strided_slice %48 {offsets = [4, 0], sizes = [2, 64], strides = [1, 1]} : vector<8x64xf32> to vector<2x64xf32>
    %c2_51 = arith.constant 2 : index
    %c0_52 = arith.constant 0 : index
    %c0_53 = arith.constant 0 : index
    %59 = vector.load %arg9[%c2_51, %c0_52, %c0_53] : memref<4x64x64xf32, #tpu.memory_space<vmem>>, vector<1x64x64xf32>
    %60 = vector.shape_cast %59 : vector<1x64x64xf32> to vector<64x64xf32>
    %cst_54 = arith.constant dense<0.000000e+00> : vector<2x64xf32>
    %61 = tpu.matmul %58, %60, %cst_54 {dimension_numbers = #tpu.dot_dimension_numbers<[1], [0], [0], [1], [0, 0, 1, 1], [], []>} : vector<2x64xf32>, vector<64x64xf32>, vector<2x64xf32> -> vector<2x64xf32>
    %62 = arith.addf %57, %61 : vector<2x64xf32>
    %63 = vector.extract_strided_slice %48 {offsets = [6, 0], sizes = [2, 64], strides = [1, 1]} : vector<8x64xf32> to vector<2x64xf32>
    %c3 = arith.constant 3 : index
    %c0_55 = arith.constant 0 : index
    %c0_56 = arith.constant 0 : index
    %64 = vector.load %arg9[%c3, %c0_55, %c0_56] : memref<4x64x64xf32, #tpu.memory_space<vmem>>, vector<1x64x64xf32>
    %65 = vector.shape_cast %64 : vector<1x64x64xf32> to vector<64x64xf32>
    %cst_57 = arith.constant dense<0.000000e+00> : vector<2x64xf32>
    %66 = tpu.matmul %63, %65, %cst_57 {dimension_numbers = #tpu.dot_dimension_numbers<[1], [0], [0], [1], [0, 0, 1, 1], [], []>} : vector<2x64xf32>, vector<64x64xf32>, vector<2x64xf32> -> vector<2x64xf32>
    %67 = arith.addf %62, %66 : vector<2x64xf32>
    %c2_58 = arith.constant 2 : index
    %c0_59 = arith.constant 0 : index
    %68 = vector.load %arg12[%c2_58, %c0_59] : memref<5x128xf32, #tpu.memory_space<vmem>>, vector<1x64xf32>
    %69 = vector.broadcast %68 : vector<1x64xf32> to vector<2x64xf32>
    %70 = arith.addf %67, %69 : vector<2x64xf32>
    %cst_60 = arith.constant 0.000000e+00 : f32
    %71 = vector.broadcast %cst_60 : f32 to vector<2x64xf32>
    %72 = arith.maximumf %70, %71 : vector<2x64xf32>
    %c0_61 = arith.constant 0 : index
    %c0_62 = arith.constant 0 : index
    %73 = vector.load %arg10[%c0_61, %c0_62] : memref<64x32xf32, #tpu.memory_space<vmem>>, vector<64x32xf32>
    %cst_63 = arith.constant dense<0.000000e+00> : vector<2x32xf32>
    %74 = tpu.matmul %72, %73, %cst_63 {dimension_numbers = #tpu.dot_dimension_numbers<[1], [0], [0], [1], [0, 0, 1, 1], [], []>} : vector<2x64xf32>, vector<64x32xf32>, vector<2x32xf32> -> vector<2x32xf32>
    %c3_64 = arith.constant 3 : index
    %c0_65 = arith.constant 0 : index
    %75 = vector.load %arg12[%c3_64, %c0_65] : memref<5x128xf32, #tpu.memory_space<vmem>>, vector<1x32xf32>
    %76 = vector.broadcast %75 : vector<1x32xf32> to vector<2x32xf32>
    %77 = arith.addf %74, %76 : vector<2x32xf32>
    %cst_66 = arith.constant 0.000000e+00 : f32
    %78 = vector.broadcast %cst_66 : f32 to vector<2x32xf32>
    %79 = arith.maximumf %77, %78 : vector<2x32xf32>
    %c0_67 = arith.constant 0 : index
    %c0_68 = arith.constant 0 : index
    %80 = vector.load %arg11[%c0_67, %c0_68] : memref<32x7xf32, #tpu.memory_space<vmem>>, vector<32x7xf32>
    %cst_69 = arith.constant dense<0.000000e+00> : vector<2x7xf32>
    %81 = tpu.matmul %79, %80, %cst_69 {dimension_numbers = #tpu.dot_dimension_numbers<[1], [0], [0], [1], [0, 0, 1, 1], [], []>} : vector<2x32xf32>, vector<32x7xf32>, vector<2x7xf32> -> vector<2x7xf32>
    %c4 = arith.constant 4 : index
    %c0_70 = arith.constant 0 : index
    %82 = vector.load %arg12[%c4, %c0_70] : memref<5x128xf32, #tpu.memory_space<vmem>>, vector<1x7xf32>
    %83 = vector.broadcast %82 : vector<1x7xf32> to vector<2x7xf32>
    %84 = arith.addf %81, %83 : vector<2x7xf32>
    %c0_71 = arith.constant 0 : index
    %c0_72 = arith.constant 0 : index
    %85 = vector.load %arg13[%c0_71, %c0_72] : memref<2x7xf32, #tpu.memory_space<vmem>>, vector<2x7xf32>
    tpu.vector_store %arg13[%c0_71, %c0_72], %84 {strides = array<i32>} : memref<2x7xf32, #tpu.memory_space<vmem>>, vector<2x7xf32>,
    return
  }
  func.func @transform_0(%arg0: i32) -> (i32, i32) {
    %c0_i32 = arith.constant 0 : i32
    %c0_i32_0 = arith.constant 0 : i32
    %c0_i32_1 = arith.constant 0 : i32
    return %c0_i32, %c0_i32_0 : i32, i32
  }
  func.func @transform_1(%arg0: i32) -> (i32, i32, i32) {
    %c0_i32 = arith.constant 0 : i32
    %c0_i32_0 = arith.constant 0 : i32
    %c0_i32_1 = arith.constant 0 : i32
    %c0_i32_2 = arith.constant 0 : i32
    return %c0_i32, %c0_i32_0, %c0_i32_1 : i32, i32, i32
  }
  func.func @transform_2(%arg0: i32) -> (i32, i32) {
    %c0_i32 = arith.constant 0 : i32
    %c0_i32_0 = arith.constant 0 : i32
    %c0_i32_1 = arith.constant 0 : i32
    return %c0_i32, %c0_i32_0 : i32, i32
  }
  func.func @transform_3(%arg0: i32) -> (i32, i32) {
    %c0_i32 = arith.constant 0 : i32
    %c0_i32_0 = arith.constant 0 : i32
    %c0_i32_1 = arith.constant 0 : i32
    return %c0_i32, %c0_i32_0 : i32, i32
  }
  func.func @transform_4(%arg0: i32) -> (i32, i32) {
    %c0_i32 = arith.constant 0 : i32
    %c0_i32_0 = arith.constant 0 : i32
    %c0_i32_1 = arith.constant 0 : i32
    return %c0_i32, %c0_i32_0 : i32, i32
  }
  func.func @transform_5(%arg0: i32) -> (i32, i32, i32) {
    %c0_i32 = arith.constant 0 : i32
    %c0_i32_0 = arith.constant 0 : i32
    %c0_i32_1 = arith.constant 0 : i32
    %c0_i32_2 = arith.constant 0 : i32
    return %c0_i32, %c0_i32_0, %c0_i32_1 : i32, i32, i32
  }
  func.func @transform_6(%arg0: i32) -> (i32, i32) {
    %c0_i32 = arith.constant 0 : i32
    %c0_i32_0 = arith.constant 0 : i32
    %c0_i32_1 = arith.constant 0 : i32
    return %c0_i32, %c0_i32_0 : i32, i32
  }
  func.func @transform_7(%arg0: i32) -> (i32, i32) {
    %c0_i32 = arith.constant 0 : i32
    %c0_i32_0 = arith.constant 0 : i32
    %c0_i32_1 = arith.constant 0 : i32
    return %c0_i32, %c0_i32_0 : i32, i32
  }
  func.func @transform_8(%arg0: i32) -> (i32, i32, i32) {
    %c0_i32 = arith.constant 0 : i32
    %c0_i32_0 = arith.constant 0 : i32
    %c0_i32_1 = arith.constant 0 : i32
    %c0_i32_2 = arith.constant 0 : i32
    return %c0_i32, %c0_i32_0, %c0_i32_1 : i32, i32, i32
  }
  func.func @transform_9(%arg0: i32) -> (i32, i32) {
    %c0_i32 = arith.constant 0 : i32
    %c0_i32_0 = arith.constant 0 : i32
    %c0_i32_1 = arith.constant 0 : i32
    return %c0_i32, %c0_i32_0 : i32, i32
  }
  func.func @transform_10(%arg0: i32) -> (i32, i32) {
    %c0_i32 = arith.constant 0 : i32
    %c0_i32_0 = arith.constant 0 : i32
    %c0_i32_1 = arith.constant 0 : i32
    return %c0_i32, %c0_i32_0 : i32, i32
  }
  func.func @transform_11(%arg0: i32) -> (i32, i32) {
    %c0_i32 = arith.constant 0 : i32
    %c0_i32_0 = arith.constant 0 : i32
    %c0_i32_1 = arith.constant 0 : i32
    return %c0_i32, %c0_i32_0 : i32, i32
  }
  func.func @transform_12(%arg0: i32) -> (i32, i32) {
    %c0_i32 = arith.constant 0 : i32
    %c0_i32_0 = arith.constant 0 : i32
    %c0_i32_1 = arith.constant 0 : i32
    return %c0_i32, %c0_i32_0 : i32, i32
  }
}

</mosaic_0001>

<bundles_post_ra>
// kernel: complexnet_forward.1
= control target key start
LH: loop header
LB: loop body
LE: loop exit
PB: predicated region body
PF: predicated region fallthrough
CT: control target
= control target key end

     0   :  { %17 = vsyncpa [#allocation3], 0  ;;  %s1359_s0 = inlined_call_operand.vmem [shape: f32[32,32], index: 0, kind: input, shape index: {}]   ;;  %s1360_s1 = inlined_call_operand.vmem [shape: f32[3,32,32], index: 1, kind: input, shape index: {}]   ;;  %s1361_s2 = inlined_call_operand.vmem [shape: f32[32,384], index: 2, kind: input, shape index: {}]   ;;  %s1362_s3 = inlined_call_operand.vmem [shape: f32[16,32], index: 3, kind: input, shape index: {}]   ;;  %s1363_s4 = inlined_call_operand.vmem [shape: f32[128,64], index: 4, kind: input, shape index: {}]   ;;  %s1364_s5 = inlined_call_operand.vmem [shape: f32[3,16,16], index: 5, kind: input, shape index: {}]   ;;  %s1365_s6 = inlined_call_operand.vmem [shape: f32[64,192], index: 6, kind: input, shape index: {}]   ;;  %s1366_s7 = inlined_call_operand.vmem [shape: f32[8,16], index: 7, kind: input, shape index: {}]   ;;  %s1367_s8 = inlined_call_operand.hbm [shape: f32[4,64,64], index: 8, kind: input, shape index: {}]   ;;  %s1368_s9 = inlined_call_operand.vmem [shape: f32[64,32], index: 9, kind: input, shape index: {}]   ;;  %s1369_s10 = inlined_call_operand.vmem [shape: f32[32,7], index: 10, kind: input, shape index: {}]   ;;  %s1370_s11 = inlined_call_operand.hbm [shape: f32[5,128], index: 11, kind: input, shape index: {}]   ;;  %s1371_s12 = inlined_call_operand.hbm [shape: f32[2,7], index: 12, kind: output, shape index: {}]  }
   0x1   :  { %18 = vsyncpa [#allocation6], 0 }
   0x2   :  { %19 = vsyncpa [#allocation4], 0  ;;  %s40_s23 = sshll.u32 %s1367_s8, 4  ;;  %s993_s24 = smov [#allocation2]   ;;  %s41_s23 = int_to_ptr.hbm [resolvable:$true] %s40_s23 }
   0x3   :  { %s42_s25 = sshll.u32 %s993_s24, 4  ;;  %s58_s28 = sshll.u32 %s1370_s11, 4  ;;  %s43_s25 = int_to_ptr.vmem [resolvable:$true] %s42_s25  ;;  %s59_s28 = int_to_ptr.hbm [resolvable:$true] %s58_s28 }
   0x4   :  { %s994_s29 = smov 128   ;;  %s995_s30 = smov 8  }
   0x5   :  { %48 = dma.hbm_to_vmem [thread:$0]  %s41_s23, 4096, %s43_s25, [#allocation3], %s994_s29, %s994_s29, %s995_s30  }
   0x6   :  { %s996_s13 = smov [#allocation5]  }
   0x7   :  { %s60_s14 = sshll.u32 %s996_s13, 4  ;;  %s61_s14 = int_to_ptr.vmem [resolvable:$true] %s60_s14 }
   0x8   :  { %63 = dma.hbm_to_vmem [thread:$0]  %s59_s28, 128, %s61_s14, [#allocation6]  }
   0x9   :  { %987 = dma.done.wait [#allocation3], 4096  }
   0xa   :  { %988 = vsyncadd [#allocation3], 4294963200 }
   0xb   :  { %989 = dma.done.wait [#allocation6], 128  }
   0xc   :  { %990 = vsyncadd [#allocation6], 4294967168  ;;  %v85_v0 = vld [vmem:[%s1361_s2 + $0x48] sm:$0xff]  ;;  %v86_v1 = vld [vmem:[%s1361_s2 + $0x50] sm:$0xff]  ;;  %vm88_vm0 = vcmask 261120   ;;  %vm431_vm1 = vcmask 523264  }
   0xd   :  { %v87_v2 = vld [vmem:[%s1361_s2 + $0x58] sm:$0xff]  ;;  %113 = vmatpush.msra.mxu0 %v85_v0  ;;  %142 = vmatpush.msra.mxu1 %v86_v1  ;;  %v82_v3 = vld [vmem:[%s1361_s2 + $0x30] sm:$0xff]  ;;  %v84_v5 = vld [vmem:[%s1361_s2 + $0x40] sm:$0xff]  ;;  %vm497_vm2 = vcmask 130048   ;;  %s998_s13 = smov [#allocation7]   ;;  %s825_s8 = sshll.u32 %s1371_s12, 4  ;;  %s826_s8 = int_to_ptr.hbm [resolvable:$true] %s825_s8 }
   0xe   :  { %v83_v4 = vld [vmem:[%s1361_s2 + $0x38] sm:$0xff]  ;;  %171 = vmatpush.msra.mxu2 %v87_v2  ;;  %v80_v7 = vld [vmem:[%s1361_s2 + $0x20] sm:$0xff]  ;;  %v81_v8 = vld [vmem:[%s1361_s2 + $0x28] sm:$0xff]  ;;  %s823_s14 = sshll.u32 %s998_s13, 4  ;;  %vm816_vm3 = vcmask 50176   ;;  %s824_s14 = int_to_ptr.vmem [resolvable:$true] %s823_s14 }
   0xf   :  { %v79_v6 = vld [vmem:[%s1361_s2 + $0x18] sm:$0xff]  ;;  %114 = vmatpush.msra.mxu0 %v82_v3  ;;  %143 = vmatpush.msra.mxu1 %v83_v4  ;;  %v76_v9 = vld [vmem:[%s1361_s2] sm:$0xff]  ;;  %v77_v10 = vld [vmem:[%s1361_s2 + $0x8] sm:$0xff] }
  0x10   :  { %172 = vmatpush.msra.mxu2 %v84_v5  ;;  %v78_v11 = vld [vmem:[%s1361_s2 + $0x10] sm:$0xff]  ;;  %v72_v12 = vld [vmem:[%s1359_s0] sm:$0xff]  ;;  %v73_v13 = vld [vmem:[%s1359_s0 + $0x8] sm:$0xff] }
  0x11   :  { %115 = vmatpush.msra.mxu0 %v79_v6  ;;  %144 = vmatpush.msra.mxu1 %v80_v7  ;;  %v74_v14 = vld [vmem:[%s1359_s0 + $0x10] sm:$0xff]  ;;  %v75_v15 = vld [vmem:[%s1359_s0 + $0x18] sm:$0xff]  ;;  %v848_v27 = vld [vmem:[%s1360_s1 + $0x20] sm:$0xff] }
  0x12   :  { %173 = vmatpush.msra.mxu2 %v81_v8  ;;  %v188_v28 = vld [vmem:[%s1360_s1] sm:$0xff]  ;;  %v356_v30 = vld [vmem:[%s1363_s4 + $0x78] sm:$0xff]  ;;  %v355_v31 = vld [vmem:[%s1363_s4 + $0x70] sm:$0xff] }
  0x13   :  { %116 = vmatpush.msra.mxu0 %v76_v9  ;;  %145 = vmatpush.msra.mxu1 %v77_v10  ;;  %v354_v32 = vld [vmem:[%s1363_s4 + $0x68] sm:$0xff]  ;;  %v860_v33 = vld [vmem:[%s1360_s1 + $0x40] sm:$0xff]  ;;  %v352_v37 = vld [vmem:[%s1363_s4 + $0x58] sm:$0xff] }
  0x14   :  { %174 = vmatpush.msra.mxu2 %v78_v11  ;;  %836 = vmatmul.msk.f32.vlgmr.msra.gmra.mxu0 %vm88_vm0, %v72_v12  ;;  %v353_v34 = vld [vmem:[%s1363_s4 + $0x60] sm:$0xff]  ;;  %v849_v35 = vld [vmem:[%s1360_s1 + $0x28] sm:$0xff]  ;;  %v351_v38 = vld [vmem:[%s1363_s4 + $0x50] sm:$0xff] }
  0x15   :  { %840 = vmatmul.msk.f32.vlgmr.msra.gmra.mxu1 %vm88_vm0, %v72_v12  ;;  %844 = vmatmul.msk.f32.vlgmr.msra.gmra.mxu2 %vm88_vm0, %v72_v12  ;;  %v189_v36 = vld [vmem:[%s1360_s1 + $0x8] sm:$0xff]  ;;  %v349_v41 = vld [vmem:[%s1363_s4 + $0x40] sm:$0xff]  ;;  %v850_v42 = vld [vmem:[%s1360_s1 + $0x30] sm:$0xff] }
  0x16   :  { %357 = vmatpush.msrb.mxu2 %v356_v30  ;;  %v350_v39 = vld [vmem:[%s1363_s4 + $0x48] sm:$0xff]  ;;  %v190_v43 = vld [vmem:[%s1360_s1 + $0x10] sm:$0xff]  ;;  %v348_v44 = vld [vmem:[%s1363_s4 + $0x38] sm:$0xff] }
  0x17   :  { %v861_v40 = vld [vmem:[%s1360_s1 + $0x48] sm:$0xff]  ;;  %v347_v45 = vld [vmem:[%s1363_s4 + $0x30] sm:$0xff]  ;;  %v851_v48 = vld [vmem:[%s1360_s1 + $0x38] sm:$0xff] }
  0x18   :  { %358 = vmatpush.msrb.mxu2 %v355_v31  ;;  %v346_v46 = vld [vmem:[%s1363_s4 + $0x28] sm:$0xff]  ;;  %v862_v47 = vld [vmem:[%s1360_s1 + $0x50] sm:$0xff]  ;;  %v191_v49 = vld [vmem:[%s1360_s1 + $0x18] sm:$0xff] }
  0x19   :  { %v863_v50 = vld [vmem:[%s1360_s1 + $0x58] sm:$0xff]  ;;  %v345_v51 = vld [vmem:[%s1363_s4 + $0x20] sm:$0xff]  ;;  %v343_v53 = vld [vmem:[%s1363_s4 + $0x10] sm:$0xff] }
  0x1a   :  { %359 = vmatpush.msrb.mxu2 %v354_v32  ;;  %v344_v52 = vld [vmem:[%s1363_s4 + $0x18] sm:$0xff]  ;;  %v342_v54 = vld [vmem:[%s1363_s4 + $0x8] sm:$0xff]  ;;  %v341_v55 = vld [vmem:[%s1363_s4] sm:$0xff] }
  0x1b   :  { %v910_v60 = vld [vmem:[#allocation5] ss:$0 sm:$0xff]  ;;  %v418_v30 = vld [vmem:[%s1365_s6 + $0x18] sm:$0xff] }
  0x1c   :  { %837 = vmatmul.msk.f32.gmra.mxu0 %vm88_vm0, %v73_v13  ;;  %360 = vmatpush.msrb.mxu2 %v353_v34  ;;  %v339_v32 = vld [vmem:[%s1362_s3] sm:$0xff] }
  0x1d   :  { %841 = vmatmul.msk.f32.gmra.mxu1 %vm88_vm0, %v73_v13  ;;  %845 = vmatmul.msk.f32.gmra.mxu2 %vm88_vm0, %v73_v13  ;;  %v427_v34 = vld [vmem:[%s1365_s6 + $0x60] sm:$0xff] }
  0x1e   :  { %361 = vmatpush.msrb.mxu2 %v352_v37  ;;  %v340_v37 = vld [vmem:[%s1362_s3 + $0x8] sm:$0xff] }
  0x20   :  { %362 = vmatpush.msrb.mxu2 %v351_v38  ;;  %v421_v38 = vld [vmem:[%s1365_s6 + $0x30] sm:$0xff] }
  0x22   :  { %363 = vmatpush.msrb.mxu2 %v350_v39  ;;  %v419_v39 = vld [vmem:[%s1365_s6 + $0x20] sm:$0xff] }
  0x24   :  { %838 = vmatmul.msk.f32.gmra.mxu0 %vm88_vm0, %v74_v14  ;;  %364 = vmatpush.msrb.mxu2 %v349_v41  ;;  %v415_v41 = vld [vmem:[%s1365_s6] sm:$0xff] }
  0x25   :  { %842 = vmatmul.msk.f32.gmra.mxu1 %vm88_vm0, %v74_v14  ;;  %846 = vmatmul.msk.f32.gmra.mxu2 %vm88_vm0, %v74_v14 }
  0x26   :  { %365 = vmatpush.msrb.mxu2 %v348_v44 }
  0x28   :  { %366 = vmatpush.msrb.mxu2 %v347_v45 }
  0x2a   :  { %367 = vmatpush.msrb.mxu2 %v346_v46 }
  0x2c   :  { %839 = vmatmul.msk.f32.gmra.mxu0 %vm88_vm0, %v75_v15  ;;  %368 = vmatpush.msrb.mxu2 %v345_v51  ;;  %v880_v51 = vld [vmem:[%s1364_s5 + $0x20] sm:$0xff] }
  0x2d   :  { %843 = vmatmul.msk.f32.gmra.mxu1 %vm88_vm0, %v75_v15  ;;  %847 = vmatmul.msk.f32.gmra.mxu2 %vm88_vm0, %v75_v15 }
  0x2e   :  { %369 = vmatpush.msrb.mxu2 %v344_v52  ;;  %v485_v52 = vld [vmem:[%s1364_s5 + $0x8] sm:$0xff] }
  0x30   :  { %370 = vmatpush.msrb.mxu2 %v343_v53  ;;  %v881_v53 = vld [vmem:[%s1364_s5 + $0x28] sm:$0xff] }
  0x32   :  { %371 = vmatpush.msrb.mxu2 %v342_v54 }
  0x34   :  { %372 = vmatpush.msrb.mxu2 %v341_v55 }
  0x91   :  { %v118_v16 = vpop.f32.mrf.mxu0 }
  0x92   :  { %v147_v17 = vpop.f32.mrf.mxu1 }
  0x98   :  { %v176_v18 = vpop.f32.mrf.mxu2 }
  0x99   :  { %v121_v19 = vpop.f32.mrf.mxu0 }
  0x9a   :  { %v150_v20 = vpop.f32.mrf.mxu1 }
  0xa0   :  { %v179_v21 = vpop.f32.mrf.mxu2 }
  0xa1   :  { %v124_v22 = vpop.f32.mrf.mxu0 }
  0xa2   :  { %v153_v23 = vpop.f32.mrf.mxu1 }
  0xa8   :  { %v182_v24 = vpop.f32.mrf.mxu2 }
  0xa9   :  { %v127_v25 = vpop.f32.mrf.mxu0 }
  0xaa   :  { %v156_v26 = vpop.f32.mrf.mxu1  ;;  %262 = vmatpush.msrb.mxu0 %v127_v25  ;;  %v426_v25 = vld [vmem:[%s1365_s6 + $0x58] sm:$0xff] }
  0xab   :  { %221 = vmatpush.msra.mxu3 %v156_v26  ;;  %v424_v26 = vld [vmem:[%s1365_s6 + $0x48] sm:$0xff] }
  0xac   :  { %263 = vmatpush.msrb.mxu0 %v124_v22 }
  0xad   :  { %222 = vmatpush.msra.mxu3 %v153_v23  ;;  %v430_v23 = vld [vmem:[%s1365_s6 + $0x78] sm:$0xff] }
  0xae   :  { %264 = vmatpush.msrb.mxu0 %v121_v19 }
  0xaf   :  { %223 = vmatpush.msra.mxu3 %v150_v20 }
  0xb0   :  { %v185_v29 = vpop.f32.mrf.mxu2  ;;  %265 = vmatpush.msrb.mxu0 %v118_v16 }
  0xb1   :  { %224 = vmatpush.msra.mxu3 %v147_v17  ;;  %308 = vmatpush.msrb.mxu1 %v185_v29  ;;  %v420_v29 = vld [vmem:[%s1365_s6 + $0x28] sm:$0xff] }
  0xb2   :  { %852 = vmatmul.msk.f32.vlgmr.msra.gmra.mxu3 %vm88_vm0, %v848_v27  ;;  %856 = vmatmul.msk.f32.vlgmr.msrb.gmra.mxu0 %vm88_vm0, %v188_v28  ;;  %v422_v27 = vld [vmem:[%s1365_s6 + $0x38] sm:$0xff] }
  0xb3   :  { %309 = vmatpush.msrb.mxu1 %v182_v24  ;;  %469 = vmatpush.msra.mxu0 %v430_v23  ;;  %v428_v24 = vld [vmem:[%s1365_s6 + $0x68] sm:$0xff] }
  0xb5   :  { %310 = vmatpush.msrb.mxu1 %v179_v21  ;;  %470 = vmatpush.msra.mxu0 %v428_v24 }
  0xb7   :  { %311 = vmatpush.msrb.mxu1 %v176_v18  ;;  %471 = vmatpush.msra.mxu0 %v426_v25 }
  0xb8   :  { %864 = vmatmul.msk.f32.vlgmr.msrb.gmra.mxu1 %vm88_vm0, %v860_v33  ;;  %v429_v33 = vld [vmem:[%s1365_s6 + $0x70] sm:$0xff] }
  0xb9   :  { %472 = vmatpush.msra.mxu0 %v424_v26 }
  0xba   :  { %853 = vmatmul.msk.f32.gmra.mxu3 %vm88_vm0, %v849_v35  ;;  %857 = vmatmul.msk.f32.gmra.mxu0 %vm88_vm0, %v189_v36  ;;  %v425_v35 = vld [vmem:[%s1365_s6 + $0x50] sm:$0xff]  ;;  %v423_v36 = vld [vmem:[%s1365_s6 + $0x40] sm:$0xff] }
  0xbb   :  { %473 = vmatpush.msra.mxu0 %v422_v27 }
  0xbd   :  { %474 = vmatpush.msra.mxu0 %v420_v29 }
  0xbf   :  { %475 = vmatpush.msra.mxu0 %v418_v30 }
  0xc0   :  { %865 = vmatmul.msk.f32.gmra.mxu1 %vm88_vm0, %v861_v40  ;;  %v417_v40 = vld [vmem:[%s1365_s6 + $0x10] sm:$0xff] }
  0xc2   :  { %854 = vmatmul.msk.f32.gmra.mxu3 %vm88_vm0, %v850_v42  ;;  %858 = vmatmul.msk.f32.gmra.mxu0 %vm88_vm0, %v190_v43  ;;  %v416_v42 = vld [vmem:[%s1365_s6 + $0x8] sm:$0xff]  ;;  %s997_s6 = smov 64  }
  0xc3   :  { %476 = vmatpush.msra.mxu0 %v416_v42 }
  0xc8   :  { %866 = vmatmul.msk.f32.gmra.mxu1 %vm88_vm0, %v862_v47 }
  0xca   :  { %855 = vmatmul.msk.f32.gmra.mxu3 %vm88_vm0, %v851_v48  ;;  %859 = vmatmul.msk.f32.gmra.mxu0 %vm88_vm0, %v191_v49 }
  0xd0   :  { %867 = vmatmul.msk.f32.gmra.mxu1 %vm88_vm0, %v863_v50  ;;  %v484_v50 = vld [vmem:[%s1364_s5] sm:$0xff] }
 0x12f   :  { %v267_v56 = vpop.f32.mrf.mxu0 }
 0x135   :  { %v226_v57 = vpop.f32.mrf.mxu3  ;;  %v313_v58 = vpop.f32.mrf.mxu1 }
 0x136   :  { %v268_v59 = vadd.f32 %v267_v56, %v226_v57  ;;  %v874_v57 = vld [vmem:[%s1364_s5 + $0x10] sm:$0xff] }
 0x137   :  { %v270_v61 = vpop.f32.mrf.mxu0 }
 0x138   :  { %v325_v62 = vadd.f32 %v313_v58, %v268_v59  ;;  %v875_v58 = vld [vmem:[%s1364_s5 + $0x18] sm:$0xff] }
 0x139   :  { %v627_v59 = vld [vmem:[#allocation2 + $0x38] sm:$0xff] }
 0x13a   :  { %v331_v63 = vadd.f32 %v910_v60, %v325_v62  ;;  %v690_v62 = vld [vmem:[#allocation2 + $0xb0] sm:$0xff] }
 0x13c   :  { %v335_v0 = vmax.f32 %v331_v63, 0.0  ;;  %v636_v63 = vld [vmem:[#allocation2 + $0x78] sm:$0xff] }
 0x13d   :  { %v229_v1 = vpop.f32.mrf.mxu3  ;;  %v316_v2 = vpop.f32.mrf.mxu1 }
 0x13e   :  { %v271_v3 = vadd.f32 %v270_v61, %v229_v1  ;;  %373 = vmatmul.f32.vlgmr.msrb.gmra.mxu2 %v335_v0  ;;  %v691_v61 = vld [vmem:[#allocation2 + $0xb8] sm:$0xff]  ;;  %v625_v0 = vld [vmem:[#allocation2 + $0x28] sm:$0xff] }
 0x13f   :  { %v273_v5 = vpop.f32.mrf.mxu0  ;;  %v689_v1 = vld [vmem:[#allocation2 + $0xa8] sm:$0xff] }
 0x140   :  { %v326_v4 = vadd.f32 %v316_v2, %v271_v3  ;;  %v635_v2 = vld [vmem:[#allocation2 + $0x70] sm:$0xff]  ;;  %v634_v3 = vld [vmem:[#allocation2 + $0x68] sm:$0xff] }
 0x142   :  { %v332_v6 = vadd.f32 %v910_v60, %v326_v4  ;;  %v624_v4 = vld [vmem:[#allocation2 + $0x20] sm:$0xff] }
 0x144   :  { %v336_v7 = vmax.f32 %v332_v6, 0.0  ;;  %v633_v6 = vld [vmem:[#allocation2 + $0x60] sm:$0xff] }
 0x145   :  { %v232_v8 = vpop.f32.mrf.mxu3  ;;  %v319_v9 = vpop.f32.mrf.mxu1 }
 0x146   :  { %v274_v10 = vadd.f32 %v273_v5, %v232_v8  ;;  %376 = vmatmul.f32.gmra.mxu2 %v336_v7  ;;  %v688_v5 = vld [vmem:[#allocation2 + $0xa0] sm:$0xff]  ;;  %v623_v7 = vld [vmem:[#allocation2 + $0x18] sm:$0xff] }
 0x147   :  { %v276_v13 = vpop.f32.mrf.mxu0  ;;  %v687_v8 = vld [vmem:[#allocation2 + $0x98] sm:$0xff] }
 0x148   :  { %v327_v11 = vadd.f32 %v319_v9, %v274_v10  ;;  %v622_v10 = vld [vmem:[#allocation2 + $0x10] sm:$0xff] }
 0x14a   :  { %v333_v12 = vadd.f32 %v910_v60, %v327_v11  ;;  %v686_v11 = vld [vmem:[#allocation2 + $0x90] sm:$0xff] }
 0x14c   :  { %v337_v14 = vmax.f32 %v333_v12, 0.0 }
 0x14d   :  { %v235_v15 = vpop.f32.mrf.mxu3  ;;  %v322_v16 = vpop.f32.mrf.mxu1 }
 0x14e   :  { %v277_v17 = vadd.f32 %v276_v13, %v235_v15  ;;  %379 = vmatmul.f32.gmra.mxu2 %v337_v14  ;;  %v621_v13 = vld [vmem:[#allocation2 + $0x8] sm:$0xff] }
 0x150   :  { %v328_v18 = vadd.f32 %v322_v16, %v277_v17 }
 0x152   :  { %v334_v19 = vadd.f32 %v910_v60, %v328_v18  ;;  %v626_v60 = vld [vmem:[#allocation2 + $0x30] sm:$0xff] }
 0x154   :  { %v338_v20 = vmax.f32 %v334_v19, 0.0 }
 0x156   :  { %382 = vmatmul.f32.gmra.mxu2 %v338_v20  ;;  %v911_v20 = vld [vmem:[#allocation5 + $0x1] ss:$0 sm:$0xff] }
 0x1c1   :  { %v374_v21 = vpop.f32.mrf.mxu2 }
 0x1c9   :  { %v377_v22 = vpop.f32.mrf.mxu2 }
 0x1d1   :  { %v380_v28 = vpop.f32.mrf.mxu2 }
 0x1d9   :  { %v383_v31 = vpop.f32.mrf.mxu2 }
 0x1da   :  { %404 = vmatpush.msrb.mxu3 %v383_v31  ;;  %v721_v31 = vld [vmem:[#allocation2 + $0xe0] sm:$0xff] }
 0x1dc   :  { %405 = vmatpush.msrb.mxu3 %v380_v28  ;;  %v724_v28 = vld [vmem:[#allocation2 + $0xf8] sm:$0xff] }
 0x1de   :  { %406 = vmatpush.msrb.mxu3 %v377_v22 }
 0x1e0   :  { %407 = vmatpush.msrb.mxu3 %v374_v21 }
 0x1e1   :  { %868 = vmatmul.msk.f32.vlgmr.msrb.gmra.mxu3 %vm88_vm0, %v339_v32  ;;  %v632_v32 = vld [vmem:[#allocation2 + $0x58] sm:$0xff] }
 0x1e2   :  { %446 = vmatpush.msra.mxu3 %v429_v33  ;;  %v720_v33 = vld [vmem:[#allocation2 + $0xd8] sm:$0xff] }
 0x1e4   :  { %447 = vmatpush.msra.mxu3 %v427_v34  ;;  %v631_v34 = vld [vmem:[#allocation2 + $0x50] sm:$0xff] }
 0x1e6   :  { %448 = vmatpush.msra.mxu3 %v425_v35  ;;  %v719_v35 = vld [vmem:[#allocation2 + $0xd0] sm:$0xff] }
 0x1e8   :  { %449 = vmatpush.msra.mxu3 %v423_v36  ;;  %v620_v36 = vld [vmem:[#allocation2] sm:$0xff] }
 0x1e9   :  { %869 = vmatmul.msk.f32.gmra.mxu3 %vm88_vm0, %v340_v37  ;;  %v685_v37 = vld [vmem:[#allocation2 + $0x88] sm:$0xff] }
 0x1ea   :  { %450 = vmatpush.msra.mxu3 %v421_v38  ;;  %v630_v38 = vld [vmem:[#allocation2 + $0x48] sm:$0xff] }
 0x1ec   :  { %451 = vmatpush.msra.mxu3 %v419_v39  ;;  %v718_v39 = vld [vmem:[#allocation2 + $0xc8] sm:$0xff] }
 0x1ee   :  { %452 = vmatpush.msra.mxu3 %v417_v40  ;;  %v684_v40 = vld [vmem:[#allocation2 + $0x80] sm:$0xff] }
 0x1f0   :  { %453 = vmatpush.msra.mxu3 %v415_v41  ;;  %v629_v41 = vld [vmem:[#allocation2 + $0x40] sm:$0xff] }
 0x1f2   :  { %891 = vmatpush.msrb.mxu3 %v430_v23 }
 0x1f4   :  { %892 = vmatpush.msrb.mxu3 %v428_v24 }
 0x1f6   :  { %893 = vmatpush.msrb.mxu3 %v426_v25 }
 0x1f8   :  { %894 = vmatpush.msrb.mxu3 %v424_v26 }
 0x1fa   :  { %895 = vmatpush.msrb.mxu3 %v422_v27  ;;  %v596_v27 = vld [vmem:[%s1366_s7] sm:$0xff] }
 0x1fc   :  { %896 = vmatpush.msrb.mxu3 %v420_v29  ;;  %v723_v29 = vld [vmem:[#allocation2 + $0xf0] sm:$0xff] }
 0x1fe   :  { %897 = vmatpush.msrb.mxu3 %v418_v30  ;;  %v722_v30 = vld [vmem:[#allocation2 + $0xe8] sm:$0xff] }
 0x200   :  { %898 = vmatpush.msrb.mxu3 %v416_v42  ;;  %v717_v42 = vld [vmem:[#allocation2 + $0xc0] sm:$0xff] }
 0x264   :  { %v409_v43 = vpop.f32.mrf.mxu3 }
 0x265   :  { %870 = vmatmul.msk.f32.vlgmr.msra.gmra.mxu3 %vm431_vm1, %v409_v43  ;;  %872 = vmatmul.msk.f32.vlgmr.msra.gmra.mxu0 %vm431_vm1, %v409_v43  ;;  %v760_v43 = vld [vmem:[%s1368_s9 + $0x38] sm:$0xff] }
 0x26c   :  { %v412_v44 = vpop.f32.mrf.mxu3 }
 0x26d   :  { %871 = vmatmul.msk.f32.gmra.mxu3 %vm431_vm1, %v412_v44 }
 0x275   :  { %873 = vmatmul.msk.f32.vlgmr.msrb.gmra.mxu3 %vm431_vm1, %v412_v44  ;;  %v759_v44 = vld [vmem:[%s1368_s9 + $0x30] sm:$0xff] }
 0x2e2   :  { %v478_v49 = vpop.f32.mrf.mxu0 }
 0x2e8   :  { %v455_v45 = vpop.f32.mrf.mxu3 }
 0x2f0   :  { %v458_v46 = vpop.f32.mrf.mxu3 }
 0x2f1   :  { %547 = vmatpush.msra.mxu2 %v458_v46  ;;  %v905_v47 = vpack.i.bf16 %v455_v45, %v458_v46 }
 0x2f3   :  { %906 = vrot.lane.b32.xlu0 %v905_v47, %s997_s6  ;;  %548 = vmatpush.msra.mxu2 %v455_v45 }
 0x2f4   :  { %878 = vmatmul.msk.f32.vlgmr.msra.gmra.mxu2 %vm497_vm2, %v484_v50  ;;  %v757_v50 = vld [vmem:[%s1368_s9 + $0x20] sm:$0xff] }
 0x2f5   :  { %671 = vmatpush.msrb.mxu2 %v627_v59 }
 0x2f7   :  { %672 = vmatpush.msrb.mxu2 %v626_v60 }
 0x2f8   :  { %v481_v48 = vpop.f32.mrf.mxu3 }
 0x2f9   :  { %579 = vmatpush.msra.mxu3 %v481_v48  ;;  %673 = vmatpush.msrb.mxu2 %v625_v0 }
 0x2fb   :  { %580 = vmatpush.msra.mxu3 %v478_v49  ;;  %674 = vmatpush.msrb.mxu2 %v624_v4  ;;  %v758_v49 = vld [vmem:[%s1368_s9 + $0x28] sm:$0xff]  ;;  %v787_v4 = vld [vmem:[%s1369_s10] sm:$0xff] }
 0x2fc   :  { %882 = vmatmul.msk.f32.vlgmr.msra.gmra.mxu3 %vm497_vm2, %v880_v51  ;;  %879 = vmatmul.msk.f32.gmra.mxu2 %vm497_vm2, %v485_v52  ;;  %v756_v51 = vld [vmem:[%s1368_s9 + $0x18] sm:$0xff]  ;;  %v755_v52 = vld [vmem:[%s1368_s9 + $0x10] sm:$0xff] }
 0x2fd   :  { %703 = vmatpush.msrb.mxu3 %v691_v61  ;;  %675 = vmatpush.msrb.mxu2 %v623_v7  ;;  %v912_v61 = vld [vmem:[#allocation5 + $0x2] ss:$0 sm:$0xff] }
 0x2ff   :  { %704 = vmatpush.msrb.mxu3 %v690_v62  ;;  %676 = vmatpush.msrb.mxu2 %v622_v10 }
 0x301   :  { %705 = vmatpush.msrb.mxu3 %v689_v1  ;;  %677 = vmatpush.msrb.mxu2 %v621_v13 }
 0x303   :  { %706 = vmatpush.msrb.mxu3 %v688_v5  ;;  %678 = vmatpush.msrb.mxu2 %v620_v36  ;;  %v913_v5 = vld [vmem:[#allocation5 + $0x3] ss:$0 sm:$0xff] }
 0x304   :  { %883 = vmatmul.msk.f32.gmra.mxu3 %vm497_vm2, %v881_v53  ;;  %v754_v53 = vld [vmem:[%s1368_s9 + $0x8] sm:$0xff] }
 0x305   :  { %707 = vmatpush.msrb.mxu3 %v687_v8 }
 0x307   :  { %708 = vmatpush.msrb.mxu3 %v686_v11 }
 0x309   :  { %709 = vmatpush.msrb.mxu3 %v685_v37 }
 0x30b   :  { %710 = vmatpush.msrb.mxu3 %v684_v40 }
 0x365   :  { %v907_v54 = vpop.permute.xlu0 %906 }
 0x366   :  { %v908_v55 = vunpack.i.l.bf16 %v907_v54  ;;  %v909_v56 = vunpack.i.h.bf16 %v907_v54  ;;  %v753_v54 = vld [vmem:[%s1368_s9] sm:$0xff] }
 0x368   :  { %518 = vmatpush.msra.mxu1 %v908_v55  ;;  %v790_v55 = vld [vmem:[%s1369_s10 + $0x18] sm:$0xff] }
 0x369   :  { %808 = vmatpush.msra.mxu2 %v790_v55 }
 0x36a   :  { %519 = vmatpush.msra.mxu1 %v909_v56 }
 0x36b   :  { %876 = vmatmul.msk.f32.vlgmr.msra.gmra.mxu1 %vm497_vm2, %v874_v57 }
 0x36c   :  { %649 = vmatpush.msrb.mxu1 %v636_v63 }
 0x36e   :  { %650 = vmatpush.msrb.mxu1 %v635_v2  ;;  %v789_v2 = vld [vmem:[%s1369_s10 + $0x10] sm:$0xff] }
 0x36f   :  { %809 = vmatpush.msra.mxu2 %v789_v2 }
 0x370   :  { %651 = vmatpush.msrb.mxu1 %v634_v3  ;;  %v788_v3 = vld [vmem:[%s1369_s10 + $0x8] sm:$0xff] }
 0x371   :  { %810 = vmatpush.msra.mxu2 %v788_v3 }
 0x372   :  { %652 = vmatpush.msrb.mxu1 %v633_v6 }
 0x373   :  { %877 = vmatmul.msk.f32.gmra.mxu1 %vm497_vm2, %v875_v58  ;;  %811 = vmatpush.msra.mxu2 %v787_v4 }
 0x374   :  { %653 = vmatpush.msrb.mxu1 %v632_v32 }
 0x376   :  { %654 = vmatpush.msrb.mxu1 %v631_v34 }
 0x377   :  { %v550_v9 = vpop.f32.mrf.mxu2 }
 0x378   :  { %655 = vmatpush.msrb.mxu1 %v630_v38 }
 0x37a   :  { %656 = vmatpush.msrb.mxu1 %v629_v41 }
 0x37c   :  { %774 = vmatpush.msra.mxu1 %v760_v43 }
 0x37e   :  { %775 = vmatpush.msra.mxu1 %v759_v44 }
 0x37f   :  { %v582_v12 = vpop.f32.mrf.mxu3  ;;  %v553_v16 = vpop.f32.mrf.mxu2 }
 0x380   :  { %776 = vmatpush.msra.mxu1 %v758_v49 }
 0x382   :  { %777 = vmatpush.msra.mxu1 %v757_v50 }
 0x384   :  { %778 = vmatpush.msra.mxu1 %v756_v51 }
 0x386   :  { %779 = vmatpush.msra.mxu1 %v755_v52 }
 0x387   :  { %v585_v18 = vpop.f32.mrf.mxu3 }
 0x388   :  { %780 = vmatpush.msra.mxu1 %v754_v53 }
 0x38a   :  { %781 = vmatpush.msra.mxu1 %v753_v54 }
 0x3e8   :  { %v521_v14 = vpop.f32.mrf.mxu1 }
 0x3e9   :  { %v551_v15 = vadd.f32 %v550_v9, %v521_v14  ;;  %v914_v9 = vld [vmem:[#allocation5 + $0x4] ss:$0 sm:$0xff] }
 0x3eb   :  { %v588_v19 = vadd.f32 %v582_v12, %v551_v15 }
 0x3ed   :  { %v592_v23 = vadd.f32 %v911_v20, %v588_v19 }
 0x3ef   :  { %v594_v26 = vmax.f32 %v592_v23, 0.0 }
 0x3f0   :  { %v524_v17 = vpop.f32.mrf.mxu1 }
 0x3f1   :  { %v554_v21 = vadd.f32 %v553_v16, %v524_v17 }
 0x3f3   :  { %v589_v22 = vadd.f32 %v585_v18, %v554_v21 }
 0x3f5   :  { %v593_v24 = vadd.f32 %v911_v20, %v589_v22 }
 0x3f7   :  { %v595_v25 = vmax.f32 %v593_v24, 0.0 }
 0x3f9   :  { %614 = vmatpush.msrb.mxu0 %v595_v25 }
 0x3fb   :  { %615 = vmatpush.msrb.mxu0 %v594_v26 }
 0x3fc   :  { %884 = vmatmul.msk.f32.vlgmr.msrb.gmra.mxu0 %vm497_vm2, %v596_v27 }
 0x3fd   :  { %736 = vmatpush.msra.mxu0 %v724_v28 }
 0x3ff   :  { %737 = vmatpush.msra.mxu0 %v723_v29 }
 0x401   :  { %738 = vmatpush.msra.mxu0 %v722_v30 }
 0x403   :  { %739 = vmatpush.msra.mxu0 %v721_v31 }
 0x405   :  { %740 = vmatpush.msra.mxu0 %v720_v33 }
 0x407   :  { %741 = vmatpush.msra.mxu0 %v719_v35 }
 0x409   :  { %742 = vmatpush.msra.mxu0 %v718_v39 }
 0x40b   :  { %743 = vmatpush.msra.mxu0 %v717_v42 }
 0x479   :  { %v617_v45 = vpop.f32.mrf.mxu0 }
 0x47a   :  { %v638_v46 = vrot.slane %v617_v45, 2  ;;  %v692_v47 = vrot.slane %v617_v45, 4  ;;  %v725_v48 = vrot.slane %v617_v45, 6  ;;  %886 = vmatmul.msk.f32.vlgmr.msrb.gmra.mxu2 %vm431_vm1, %v617_v45 }
 0x47c   :  { %887 = vmatmul.msk.f32.vlgmr.msrb.gmra.mxu3 %vm431_vm1, %v692_v47  ;;  %885 = vmatmul.msk.f32.vlgmr.msrb.gmra.mxu1 %vm431_vm1, %v638_v46 }
 0x47d   :  { %888 = vmatmul.msk.f32.vlgmr.msra.gmra.mxu0 %vm431_vm1, %v725_v48 }
 0x4f9   :  { %v658_v56 = vpop.f32.mrf.mxu1 }
 0x4fa   :  { %v745_v62 = vpop.f32.mrf.mxu0 }
 0x4fd   :  { %v680_v57 = vpop.f32.mrf.mxu2 }
 0x4fe   :  { %v681_v58 = vadd.f32 %v680_v57, %v658_v56 }
 0x4ff   :  { %v712_v59 = vpop.f32.mrf.mxu3 }
 0x500   :  { %v715_v60 = vadd.f32 %v712_v59, %v681_v58 }
 0x502   :  { %v748_v63 = vadd.f32 %v745_v62, %v715_v60 }
 0x504   :  { %v751_v0 = vadd.f32 %v912_v61, %v748_v63 }
 0x506   :  { %v752_v1 = vmax.f32 %v751_v0, 0.0 }
 0x508   :  { %889 = vmatmul.msk.f32.vlgmr.msra.gmra.mxu1 %vm431_vm1, %v752_v1 }
 0x585   :  { %v783_v6 = vpop.f32.mrf.mxu1 }
 0x586   :  { %v784_v7 = vadd.f32 %v913_v5, %v783_v6 }
 0x588   :  { %v786_v8 = vmax.f32 %v784_v7, 0.0 }
 0x58a   :  { %890 = vmatmul.msk.f32.vlgmr.msra.gmra.mxu2 %vm88_vm0, %v786_v8 }
 0x60d   :  { %v813_v10 = vpop.f32.mrf.mxu2 }
 0x60e   :  { %v814_v11 = vadd.f32 %v914_v9, %v813_v10 }
 0x610   :  { %817 = vst.msk [vmem:[#allocation7] sm:$0x3] %vm816_vm3, %v814_v11 }
 0x611   :  { %828 = dma.vmem_to_hbm [thread:$0]  %s824_s14, 32, %s826_s8, [#allocation4]  }
 0x612   :  { %991 = dma.done.wait [#allocation4], 32  }
 0x613   :  { %992 = vsyncadd [#allocation4], 4294967264 }
 0x614   :  { %833 = vsyncpa [#allocation3], 1 }
 0x615   :  { %834 = vsyncpa [#allocation6], 1 }
 0x616   :  { %835 = vsyncpa [#allocation4], 1 }

</bundles_post_ra>
